<compile_context>
chip_gen: v7x
topology: tpu7x:2x2x1
jax: 0.10.0
libtpu: 0.0.40
codegen_flags: <defaults>
</compile_context>

<pallas_src>
import functools

import jax
import jax.numpy as jnp
from jax import lax
from jax.experimental import pallas as pl
from jax.experimental.pallas import tpu as pltpu


def _lsce_kernel(x_ref, t_ref, smooth_ref, nll_ref, cnt_ref, *,
                 ignore_index, n_rows, mask_tail):
    x = x_ref[...].astype(jnp.float32)           # (TN, C) f32 math
    t = t_ref[...]                               # (TN, 1) int32
    tn, c = x.shape

    # Row-wise stable logsumexp.
    m = jnp.max(x, axis=-1, keepdims=True)                            # (TN, 1)
    lse = jnp.log(jnp.sum(jnp.exp(x - m), axis=-1, keepdims=True)) + m

    # Label-smoothing term per row: sum_c -log_softmax(x) = C*lse - sum_c x.
    smooth_rows = lse * jnp.float32(c) - jnp.sum(x, axis=-1, keepdims=True)

    # NLL term per row: lse - x[n, target[n]] via one-hot compare on x itself.
    col = lax.broadcasted_iota(jnp.int32, x.shape, 1)                 # (TN, C)
    picked = jnp.sum(jnp.where(col == t, x, 0.0), axis=-1, keepdims=True)
    valid = t != ignore_index                                         # (TN, 1)
    nll_rows = jnp.where(valid, lse - picked, 0.0)
    cnt_rows = valid.astype(jnp.float32)

    if mask_tail:  # static: only emitted when N was padded up to the tile size
        row0 = pl.program_id(0) * tn
        ridx = row0 + lax.broadcasted_iota(jnp.int32, (tn, 1), 0)
        smooth_rows = jnp.where(ridx < n_rows, smooth_rows, 0.0)
        # nll/cnt rows in the padding are already 0 (padded target == ignore_index)

    smooth_ref[...] = smooth_rows
    nll_ref[...] = nll_rows
    cnt_ref[...] = cnt_rows


def _pick_row_tile(n, c, itemsize, vmem_budget_bytes):
    # Per row: C*itemsize streamed (double-buffered) + a few f32 (TN, C)
    # temporaries (x_f32, exp, one-hot compare) alive in VMEM / vregs.
    bytes_per_row = c * (2 * itemsize + 16)
    rt = vmem_budget_bytes // max(bytes_per_row, 1)
    rt = max(8, min(1024, rt))
    rt = max(8, (rt // 8) * 8)
    n_pad8 = -(-n // 8) * 8          # never bigger than the 8-aligned row count
    return min(rt, n_pad8)


def label_smoothing_cross_entropy(logits, targets, *, eps=0.1, reduction="mean",
                                  ignore_index=-100, row_tile=None,
                                  vmem_budget_bytes=24 * 1024 * 1024):
    """logits: [N, C] float (f32 or bf16); targets: [N] int.

    reduction in {'mean', 'sum', 'none'}; matches the PyTorch module, including
    the quirk that under 'mean' the smoothing term averages over ALL rows while
    the NLL term averages only over non-ignored rows.
    """
    n, c = logits.shape
    if row_tile is None:
        row_tile = _pick_row_tile(n, c, jnp.dtype(logits.dtype).itemsize,
                                  vmem_budget_bytes)
    row_tile = max(8, (int(row_tile) // 8) * 8)
    n_tiles = -(-n // row_tile)
    n_pad = n_tiles * row_tile
    # TODO(synk): for very large C (f32 vocab >= ~256k) even an 8-row tile
    # overflows the VMEM budget; that case needs a class-axis grid dimension
    # with an online (flash-style) logsumexp accumulator.

    targets_i = targets.astype(jnp.int32)
    if n_pad != n:
        logits_p = jnp.pad(logits, ((0, n_pad - n), (0, 0)))
        targets_i = jnp.pad(targets_i, (0, n_pad - n), constant_values=ignore_index)
    else:
        logits_p = logits
    targets2d = targets_i.reshape(n_pad, 1)

    kernel = functools.partial(_lsce_kernel, ignore_index=ignore_index,
                               n_rows=n, mask_tail=(n_pad != n))

    rows_shape = jax.ShapeDtypeStruct((n_pad, 1), jnp.float32)
    rows_spec = pl.BlockSpec((row_tile, 1), lambda i: (i, 0))

    smooth_rows, nll_rows, cnt_rows = pl.pallas_call(
        kernel,
        out_shape=(rows_shape, rows_shape, rows_shape),
        grid_spec=pltpu.PrefetchScalarGridSpec(
            num_scalar_prefetch=0,
            grid=(n_tiles,),
            in_specs=[
                pl.BlockSpec((row_tile, c), lambda i: (i, 0)),
                pl.BlockSpec((row_tile, 1), lambda i: (i, 0)),
            ],
            out_specs=[rows_spec, rows_spec, rows_spec],
        ),
        compiler_params=pltpu.CompilerParams(
            dimension_semantics=("parallel",),
            vmem_limit_bytes=64 * 1024 * 1024),
    )(logits_p, targets2d)

    smooth_rows = smooth_rows[:, 0]
    nll_rows = nll_rows[:, 0]

    if reduction == "none":
        return smooth_rows[:n] * (eps / c) + (1.0 - eps) * nll_rows[:n]

    smooth_sum = jnp.sum(smooth_rows)
    nll_sum = jnp.sum(nll_rows)
    cnt = jnp.sum(cnt_rows)

    if reduction == "sum":
        smooth = smooth_sum
        nll = nll_sum
    elif reduction == "mean":
        # PyTorch quirk reproduced exactly: the smoothing term averages over
        # ALL rows, while F.nll_loss averages only over non-ignored rows.
        # (If every row is ignored, cnt == 0 and this is NaN, like nll_loss.)
        smooth = smooth_sum / jnp.float32(n)
        nll = nll_sum / cnt
    else:
        raise ValueError(f"unsupported reduction: {reduction!r}")

    return smooth * (eps / c) + (1.0 - eps) * nll


def _reference(logits, targets, *, eps=0.1, reduction="mean", ignore_index=-100):
    """Pure-JAX reference mirroring the PyTorch module."""
    n, c = logits.shape
    logp = jax.nn.log_softmax(logits.astype(jnp.float32), axis=-1)
    valid = targets != ignore_index
    picked = jnp.take_along_axis(
        logp, jnp.clip(targets, 0, c - 1)[:, None], axis=1)[:, 0]
    nll_rows = jnp.where(valid, -picked, 0.0)
    smooth_rows = -jnp.sum(logp, axis=-1)
    if reduction == "none":
        return smooth_rows * (eps / c) + (1.0 - eps) * nll_rows
    if reduction == "sum":
        smooth = jnp.sum(smooth_rows)
        nll = jnp.sum(nll_rows)
    else:
        smooth = jnp.mean(smooth_rows)
        nll = jnp.sum(nll_rows) / jnp.sum(valid.astype(jnp.float32))
    return smooth * (eps / c) + (1.0 - eps) * nll


if __name__ == "__main__":
    key = jax.random.PRNGKey(0)

    # Case 1: f32, 'mean', with ignored rows (matches the module's [N, C] spec).
    k1, k2 = jax.random.split(key)
    n, c = 16, 32
    logits = jax.random.normal(k1, (n, c), dtype=jnp.float32)
    targets = jax.random.randint(k2, (n,), 0, c, dtype=jnp.int32)
    targets = targets.at[3].set(-100).at[11].set(-100)
    out = jax.block_until_ready(
        label_smoothing_cross_entropy(logits, targets, eps=0.1, reduction="mean"))
    ref = _reference(logits, targets, eps=0.1, reduction="mean")
    assert jnp.allclose(out, ref, rtol=1e-5, atol=1e-4), (out, ref)

    # Case 2: N not a multiple of the tile (exercises tail padding/masking), 'sum'.
    k3, k4 = jax.random.split(k1)
    n, c = 20, 48
    logits = jax.random.normal(k3, (n, c), dtype=jnp.float32)
    targets = jax.random.randint(k4, (n,), 0, c, dtype=jnp.int32)
    targets = targets.at[0].set(-100)
    out = jax.block_until_ready(
        label_smoothing_cross_entropy(logits, targets, eps=0.1, reduction="sum"))
    ref = _reference(logits, targets, eps=0.1, reduction="sum")
    assert jnp.allclose(out, ref, rtol=1e-5, atol=1e-4), (out, ref)

    # Case 3: bf16 logits stay bf16 on the HBM side (half the DMA traffic),
    # f32 math inside the kernel; 'none' reduction returns per-row losses.
    k5, k6 = jax.random.split(k2)
    n, c = 64, 128
    logits = jax.random.normal(k5, (n, c), dtype=jnp.float32).astype(jnp.bfloat16)
    targets = jax.random.randint(k6, (n,), 0, c, dtype=jnp.int32)
    targets = targets.at[7].set(-100)
    out = jax.block_until_ready(
        label_smoothing_cross_entropy(logits, targets, eps=0.1, reduction="none"))
    ref = _reference(logits, targets, eps=0.1, reduction="none")
    assert jnp.allclose(out, ref, rtol=2e-5, atol=2e-4), (out, ref)

    print("KERNEL_OK")
</pallas_src>

<mosaic_0001>
module attributes {stable_mosaic.version = 11 : i64} {
  func.func @_lsce_kernel(%arg0: i32, %arg1: memref<16x32xf32, #tpu.memory_space<vmem>>, %arg2: memref<16x1xi32, #tpu.memory_space<vmem>>, %arg3: memref<16x1xf32, #tpu.memory_space<vmem>>, %arg4: memref<16x1xf32, #tpu.memory_space<vmem>>, %arg5: memref<16x1xf32, #tpu.memory_space<vmem>>) attributes {dimension_semantics = [#tpu.dimension_semantics<parallel>], iteration_bounds = array<i64: 1>, scalar_prefetch = 0 : i64, scratch_operands = 0 : i64, tpu.core_type = #tpu.core_type<tc>, window_params = [{transform_indices = @transform_0, window_bounds = array<i64: 16, 32>}, {transform_indices = @transform_1, window_bounds = array<i64: 16, 1>}, {transform_indices = @transform_2, window_bounds = array<i64: 16, 1>}, {transform_indices = @transform_3, window_bounds = array<i64: 16, 1>}, {transform_indices = @transform_4, window_bounds = array<i64: 16, 1>}]} {
    %c0 = arith.constant 0 : index
    %c0_0 = arith.constant 0 : index
    %0 = vector.load %arg1[%c0, %c0_0] : memref<16x32xf32, #tpu.memory_space<vmem>>, vector<16x32xf32>
    %c0_1 = arith.constant 0 : index
    %c0_2 = arith.constant 0 : index
    %1 = vector.load %arg2[%c0_1, %c0_2] : memref<16x1xi32, #tpu.memory_space<vmem>>, vector<16x1xi32>
    %cst = arith.constant dense<0xFF800000> : vector<16xf32>
    %2 = vector.multi_reduction <maximumf>, %0, %cst [1] : vector<16x32xf32> to vector<16xf32>
    %3 = vector.shape_cast %2 : vector<16xf32> to vector<16x1xf32>
    %4 = vector.broadcast %3 : vector<16x1xf32> to vector<16x32xf32>
    %5 = arith.subf %0, %4 : vector<16x32xf32>
    %6 = math.exp %5 : vector<16x32xf32>
    %cst_3 = arith.constant dense<0.000000e+00> : vector<16xf32>
    %7 = vector.multi_reduction <add>, %6, %cst_3 [1] : vector<16x32xf32> to vector<16xf32>
    %8 = vector.shape_cast %7 : vector<16xf32> to vector<16x1xf32>
    %9 = math.log %8 : vector<16x1xf32>
    %10 = arith.addf %9, %3 : vector<16x1xf32>
    %cst_4 = arith.constant 3.200000e+01 : f32
    %11 = vector.broadcast %cst_4 : f32 to vector<16x1xf32>
    %12 = arith.mulf %10, %11 : vector<16x1xf32>
    %cst_5 = arith.constant dense<0.000000e+00> : vector<16xf32>
    %13 = vector.multi_reduction <add>, %0, %cst_5 [1] : vector<16x32xf32> to vector<16xf32>
    %14 = vector.shape_cast %13 : vector<16xf32> to vector<16x1xf32>
    %15 = arith.subf %12, %14 : vector<16x1xf32>
    %16 = tpu.iota {dimensions = array<i32: 1>} : vector<16x32xi32>
    %17 = vector.broadcast %1 : vector<16x1xi32> to vector<16x32xi32>
    %18 = arith.cmpi eq, %16, %17 : vector<16x32xi32>
    %cst_6 = arith.constant 0.000000e+00 : f32
    %19 = vector.broadcast %cst_6 : f32 to vector<16x32xf32>
    %20 = arith.select %18, %0, %19 : vector<16x32xi1>, vector<16x32xf32>
    %cst_7 = arith.constant dense<0.000000e+00> : vector<16xf32>
    %21 = vector.multi_reduction <add>, %20, %cst_7 [1] : vector<16x32xf32> to vector<16xf32>
    %22 = vector.shape_cast %21 : vector<16xf32> to vector<16x1xf32>
    %c-100_i32 = arith.constant -100 : i32
    %23 = vector.broadcast %c-100_i32 : i32 to vector<16x1xi32>
    %24 = arith.cmpi ne, %1, %23 : vector<16x1xi32>
    %25 = arith.subf %10, %22 : vector<16x1xf32>
    %cst_8 = arith.constant 0.000000e+00 : f32
    %26 = vector.broadcast %cst_8 : f32 to vector<16x1xf32>
    %27 = arith.select %24, %25, %26 : vector<16x1xi1>, vector<16x1xf32>
    %28 = arith.extui %24 : vector<16x1xi1> to vector<16x1xi32>
    %29 = arith.sitofp %28 : vector<16x1xi32> to vector<16x1xf32>
    %c0_9 = arith.constant 0 : index
    %c0_10 = arith.constant 0 : index
    %30 = vector.load %arg3[%c0_9, %c0_10] : memref<16x1xf32, #tpu.memory_space<vmem>>, vector<16x1xf32>
    tpu.vector_store %arg3[%c0_9, %c0_10], %15 {strides = array<i32>} : memref<16x1xf32, #tpu.memory_space<vmem>>, vector<16x1xf32>,
    %c0_11 = arith.constant 0 : index
    %c0_12 = arith.constant 0 : index
    %31 = vector.load %arg4[%c0_11, %c0_12] : memref<16x1xf32, #tpu.memory_space<vmem>>, vector<16x1xf32>
    tpu.vector_store %arg4[%c0_11, %c0_12], %27 {strides = array<i32>} : memref<16x1xf32, #tpu.memory_space<vmem>>, vector<16x1xf32>,
    %c0_13 = arith.constant 0 : index
    %c0_14 = arith.constant 0 : index
    %32 = vector.load %arg5[%c0_13, %c0_14] : memref<16x1xf32, #tpu.memory_space<vmem>>, vector<16x1xf32>
    tpu.vector_store %arg5[%c0_13, %c0_14], %29 {strides = array<i32>} : memref<16x1xf32, #tpu.memory_space<vmem>>, vector<16x1xf32>,
    return
  }
  func.func @transform_0(%arg0: i32) -> (i32, i32) {
    %c0_i32 = arith.constant 0 : i32
    %c0_i32_0 = arith.constant 0 : i32
    return %arg0, %c0_i32 : i32, i32
  }
  func.func @transform_1(%arg0: i32) -> (i32, i32) {
    %c0_i32 = arith.constant 0 : i32
    %c0_i32_0 = arith.constant 0 : i32
    return %arg0, %c0_i32 : i32, i32
  }
  func.func @transform_2(%arg0: i32) -> (i32, i32) {
    %c0_i32 = arith.constant 0 : i32
    %c0_i32_0 = arith.constant 0 : i32
    return %arg0, %c0_i32 : i32, i32
  }
  func.func @transform_3(%arg0: i32) -> (i32, i32) {
    %c0_i32 = arith.constant 0 : i32
    %c0_i32_0 = arith.constant 0 : i32
    return %arg0, %c0_i32 : i32, i32
  }
  func.func @transform_4(%arg0: i32) -> (i32, i32) {
    %c0_i32 = arith.constant 0 : i32
    %c0_i32_0 = arith.constant 0 : i32
    return %arg0, %c0_i32 : i32, i32
  }
}

</mosaic_0001>

<bundles_post_ra>
// kernel: tpu_custom_call.1
= control target key start
LH: loop header
LB: loop body
LE: loop exit
PB: predicated region body
PF: predicated region fallthrough
CT: control target
= control target key end

     0   :  { %10 = vsyncpa [#allocation3], 0  ;;  %s453_s0 = inlined_call_operand.hbm [shape: f32[16,32], index: 0, kind: input, shape index: {}]   ;;  %s454_s1 = inlined_call_operand.hbm [shape: s32[16,1], index: 1, kind: input, shape index: {}]   ;;  %s455_s2 = inlined_call_operand.hbm [shape: f32[16,1], index: 2, kind: output, shape index: {0}]   ;;  %s456_s3 = inlined_call_operand.hbm [shape: f32[16,1], index: 3, kind: output, shape index: {1}]   ;;  %s457_s4 = inlined_call_operand.hbm [shape: f32[16,1], index: 4, kind: output, shape index: {2}]  }
   0x1   :  { %11 = vsyncpa [#allocation6], 0 }
   0x2   :  { %12 = vsyncpa [#allocation4], 0 }
   0x3   :  { %13 = vsyncpa [#allocation9], 0  ;;  %s306_s15 = smov [#allocation2]   ;;  %s188_s19 = scalar_lea.hbm %s453_s0, 256 }
   0x4   :  { %s19_s16 = sshll.u32 %s306_s15, 4  ;;  %p189_p0 = scmp.ne.s32.totalorder %s453_s0, %s188_s19  ;;  %s20_s16 = int_to_ptr.vmem [resolvable:$true] %s19_s16 }
   0x5   :  { %p192_p1 = scmp.lt.u32.totalorder %s188_s19, %s453_s0 }
   0x7   :  { %p194_p2 = pnand %p192_p1, %p189_p0 }
   0x9   :  { %197 = shalt.err (!%p194_p2)
}
   0xa   :  { %s198_s24 = scalar_lea.vmem %s20_s16, 256  ;;  %p203_p4 = scmp.lt.s32.totalorder %s20_s16, %s20_s16 }
   0xb   :  { %p199_p3 = scmp.ne.s32.totalorder %s20_s16, %s198_s24  ;;  %p204_p5 = scmp.lt.s32.totalorder %s198_s24, %s198_s24 }
   0xd   :  { %p205_p6 = por %p204_p5, %p203_p4 }
   0xf   :  { %p206_p7 = pnand %p205_p6, %p199_p3 }
  0x11   :  { %209 = shalt.err (!%p206_p7)
}
  0x12   :  { %s307_s25 = smov 128   ;;  %s308_s26 = smov 8  }
  0x13   :  { %25 = dma.hbm_to_vmem [thread:$0]  %s453_s0, 256, %s20_s16, [#allocation3], %s307_s25, %s307_s25, %s308_s26  }
  0x14   :  { %s309_s29 = smov [#allocation5]   ;;  %s210_s7 = scalar_lea.hbm %s454_s1, 256 }
  0x15   :  { %s31_s30 = sshll.u32 %s309_s29, 4  ;;  %p211_p8 = scmp.ne.s32.totalorder %s454_s1, %s210_s7  ;;  %s32_s30 = int_to_ptr.vmem [resolvable:$true] %s31_s30 }
  0x16   :  { %p214_p9 = scmp.lt.u32.totalorder %s210_s7, %s454_s1 }
  0x18   :  { %p216_p10 = pnand %p214_p9, %p211_p8 }
  0x1a   :  { %219 = shalt.err (!%p216_p10)
}
  0x1b   :  { %s220_s12 = scalar_lea.vmem %s32_s30, 256  ;;  %p225_p12 = scmp.lt.s32.totalorder %s32_s30, %s32_s30 }
  0x1c   :  { %p221_p11 = scmp.ne.s32.totalorder %s32_s30, %s220_s12  ;;  %p226_p13 = scmp.lt.s32.totalorder %s220_s12, %s220_s12 }
  0x1e   :  { %p227_p0 = por %p226_p13, %p225_p12 }
  0x20   :  { %p228_p1 = pnand %p227_p0, %p221_p11 }
  0x22   :  { %231 = shalt.err (!%p228_p1)
}
  0x23   :  { %37 = dma.hbm_to_vmem [thread:$0]  %s454_s1, 256, %s32_s30, [#allocation6], %s307_s25, %s307_s25, %s308_s26  }
  0x24   :  { %298 = dma.done.wait [#allocation3], 256  }
  0x25   :  { %299 = vsyncadd [#allocation3], 4294967040 }
  0x26   :  { %300 = dma.done.wait [#allocation6], 256  }
  0x27   :  { %301 = vsyncadd [#allocation6], 4294967040  ;;  %v310_v0 = vmov 0   ;;  %vm48_vm0 = vcmask 261120   ;;  %v44_v1 = vld [vmem:[#allocation2] sm:$0xff]  ;;  %v45_v2 = vld [vmem:[#allocation2 + $0x8] sm:$0xff]  ;;  %v83_v14 = vlaneseq }
  0x28   :  { %178 = vset.pattern.permute.xlu1 %v310_v0  ;;  %179 = vset.pattern.permute.xlu0 %v310_v0  ;;  %v46_v3 = vld [vmem:[#allocation5] sm:$0xff]  ;;  %v49_v4 = vsel %vm48_vm0, %v44_v1, -inf  ;;  %v371_v5 = vld [vmem:[#allocation5 + $0x8] sm:$0xff]  ;;  %vm111_vm2 = vcmask 7168   ;;  %v311_v6 = vmov 0.0   ;;  %v52_v8 = vsel %vm48_vm0, %v45_v2, -inf }
  0x29   :  { %86 = vperm.xlu1 %178, %v46_v3   ;;  %vm101_vm1 = vcmp.ne.s32.totalorder %v46_v3, 4294967196  ;;  %50 = vmax.xlane.f32.xlu0 %v49_v4  ;;  %vm102_vm3 = vcmp.ne.s32.totalorder %v371_v5, 4294967196  ;;  %v84_v18 = vand.u32 127, %v83_v14  ;;  %v75_v28 = vsel %vm48_vm0, %v44_v1, 0.0  ;;  %s312_s1 = smov [#allocation8]   ;;  %s313_s15 = smov [#allocation7]  }
  0x2a   :  { %v167_v7 = vsel %vm101_vm1, 1.0, %v311_v6  ;;  %v168_v9 = vsel %vm102_vm3, 1.0, %v311_v6  ;;  %v78_v29 = vsel %vm48_vm0, %v45_v2, 0.0  ;;  %s135_s14 = sshll.u32 %s312_s1, 4  ;;  %s123_s16 = sshll.u32 %s313_s15, 4  ;;  %s136_s14 = int_to_ptr.vmem [resolvable:$true] %s135_s14  ;;  %s392_s16 = int_to_ptr.vmem [resolvable:$true] %s123_s16 }
  0x2b   :  { %116 = vst.msk [vmem:[#allocation10] sm:$0xff] %vm111_vm2, %v167_v7  ;;  %117 = vst.msk [vmem:[#allocation10 + $0x8] sm:$0xff] %vm111_vm2, %v168_v9  ;;  %s314_s17 = smov [#allocation10]   ;;  %s232_s19 = scalar_lea.vmem %s136_s14, 256 }
  0x2c   :  { %s147_s18 = sshll.u32 %s314_s17, 4  ;;  %p233_p2 = scmp.ne.s32.totalorder %s136_s14, %s232_s19  ;;  %s395_s18 = int_to_ptr.vmem [resolvable:$true] %s147_s18 }
  0x2d   :  { %89 = vperm.xlu1 %178, %v371_v5   ;;  %53 = vmax.xlane.f32.xlu0 %v52_v8  ;;  %p237_p3 = scmp.lt.s32.totalorder %s136_s14, %s136_s14  ;;  %p238_p4 = scmp.lt.s32.totalorder %s232_s19, %s232_s19 }
  0x2f   :  { %p239_p5 = por %p238_p4, %p237_p3 }
  0x31   :  { %p240_p6 = pnand %p239_p5, %p233_p2 }
  0xa8   :  { %v87_v17 = vpop.permute.xlu1 %86 }
  0xa9   :  { %vm91_vm4 = vcmp.eq.s32.totalorder %v84_v18, %v87_v17 }
  0xaa   :  { %v93_v21 = vsel %vm91_vm4, %v44_v1, 0.0 }
  0xab   :  { %v95_v23 = vsel %vm48_vm0, %v93_v21, 0.0 }
  0xac   :  { %v90_v19 = vpop.permute.xlu1 %89 }
  0xad   :  { %vm92_vm5 = vcmp.eq.s32.totalorder %v84_v18, %v90_v19 }
  0xae   :  { %v94_v25 = vsel %vm92_vm5, %v45_v2, 0.0 }
  0xaf   :  { %v98_v27 = vsel %vm48_vm0, %v94_v25, 0.0 }
  0xb6   :  { %v51_v10 = vpop.xlane.xlu0 %50 }
  0xb7   :  { %v55_v11 = vsub.f32 %v44_v1, %v51_v10 }
  0xb9   :  { %v57_v12 = vmul.f32 1.442695, %v55_v11 }
  0xba   :  { %v54_v13 = vpop.xlane.xlu0 %53 }
  0xbb   :  { %180 = vpow2.f32 %v57_v12  ;;  %v56_v15 = vsub.f32 %v45_v2, %v54_v13 }
  0xbd   :  { %v59_v16 = vmul.f32 1.442695, %v56_v15 }
  0xbf   :  { %182 = vpow2.f32 %v59_v16 }
  0xc5   :  { %v181_v20 = vpop.eup %180 }
  0xc6   :  { %v61_v22 = vsel %vm48_vm0, %v181_v20, 0.0 }
  0xc7   :  { %62 = vadd.xlane.f32.xlu0 %v61_v22 }
  0xc9   :  { %v183_v24 = vpop.eup %182 }
  0xca   :  { %v64_v26 = vsel %vm48_vm0, %v183_v24, 0.0 }
  0xcb   :  { %65 = vadd.xlane.f32.xlu1 %v64_v26  ;;  %96 = vadd.xlane.f32.xlu0 %v95_v23 }
  0xcf   :  { %99 = vadd.xlane.f32.xlu0 %v98_v27 }
  0xd3   :  { %76 = vadd.xlane.f32.xlu0 %v75_v28 }
  0xd7   :  { %79 = vadd.xlane.f32.xlu0 %v78_v29 }
 0x154   :  { %v63_v30 = vpop.xlane.xlu0 %62 }
 0x155   :  { %184 = vlog2.f32 %v63_v30 }
 0x158   :  { %v66_v31 = vpop.xlane.xlu1 %65  ;;  %v97_v32 = vpop.xlane.xlu0 %96 }
 0x159   :  { %186 = vlog2.f32 %v66_v31 }
 0x15c   :  { %v100_v33 = vpop.xlane.xlu0 %99 }
 0x15f   :  { %v185_v34 = vpop.eup %184 }
 0x160   :  { %v68_v35 = vmul.f32 0.6931472, %v185_v34  ;;  %v77_v36 = vpop.xlane.xlu0 %76 }
 0x162   :  { %v71_v37 = vadd.f32 %v68_v35, %v51_v10 }
 0x163   :  { %v187_v38 = vpop.eup %186 }
 0x164   :  { %v70_v39 = vmul.f32 0.6931472, %v187_v38  ;;  %v103_v40 = vsub.f32 %v71_v37, %v97_v32  ;;  %v73_v41 = vmul.f32 32.0, %v71_v37  ;;  %v80_v45 = vpop.xlane.xlu0 %79 }
 0x166   :  { %v105_v42 = vsel %vm101_vm1, %v103_v40, 0.0  ;;  %v72_v43 = vadd.f32 %v70_v39, %v54_v13  ;;  %v81_v44 = vsub.f32 %v73_v41, %v77_v36 }
 0x167   :  { %114 = vst.msk [vmem:[#allocation8] sm:$0xff] %vm111_vm2, %v105_v42 }
 0x168   :  { %v104_v46 = vsub.f32 %v72_v43, %v100_v33  ;;  %112 = vst.msk [vmem:[#allocation7] sm:$0xff] %vm111_vm2, %v81_v44  ;;  %v74_v47 = vmul.f32 32.0, %v72_v43 }
 0x16a   :  { %v106_v48 = vsel %vm102_vm3, %v104_v46, 0.0  ;;  %v82_v49 = vsub.f32 %v74_v47, %v80_v45 }
 0x16b   :  { %115 = vst.msk [vmem:[#allocation8 + $0x8] sm:$0xff] %vm111_vm2, %v106_v48 }
 0x16c   :  { %113 = vst.msk [vmem:[#allocation7 + $0x8] sm:$0xff] %vm111_vm2, %v82_v49 }
 0x16d   :  { %243 = shalt.err (!%p240_p6)
}
 0x16e   :  { %s244_s22 = scalar_lea.hbm %s456_s3, 256 }
 0x16f   :  { %p245_p7 = scmp.ne.s32.totalorder %s456_s3, %s244_s22  ;;  %p248_p8 = scmp.lt.u32.totalorder %s244_s22, %s456_s3 }
 0x171   :  { %p250_p9 = pnand %p248_p8, %p245_p7 }
 0x173   :  { %253 = shalt.err (!%p250_p9)
}
 0x174   :  { %141 = dma.vmem_to_hbm [thread:$0]  %s136_s14, 256, %s456_s3, [#allocation9], %s307_s25, %s307_s25, %s308_s26  }
 0x175   :  { %s254_s5 = scalar_lea.vmem %s392_s16, 256  ;;  %p259_p11 = scmp.lt.s32.totalorder %s392_s16, %s392_s16 }
 0x176   :  { %p255_p10 = scmp.ne.s32.totalorder %s392_s16, %s254_s5  ;;  %p260_p12 = scmp.lt.s32.totalorder %s254_s5, %s254_s5 }
 0x178   :  { %p261_p13 = por %p260_p12, %p259_p11 }
 0x17a   :  { %p262_p0 = pnand %p261_p13, %p255_p10 }
 0x17c   :  { %265 = shalt.err (!%p262_p0)
}
 0x17d   :  { %s266_s8 = scalar_lea.hbm %s455_s2, 256 }
 0x17e   :  { %p267_p1 = scmp.ne.s32.totalorder %s455_s2, %s266_s8  ;;  %p270_p2 = scmp.lt.u32.totalorder %s266_s8, %s455_s2 }
 0x180   :  { %p272_p3 = pnand %p270_p2, %p267_p1 }
 0x182   :  { %275 = shalt.err (!%p272_p3)
}
 0x183   :  { %129 = dma.vmem_to_hbm [thread:$0]  %s392_s16, 256, %s455_s2, [#allocation4], %s307_s25, %s307_s25, %s308_s26  }
 0x184   :  { %s276_s13 = scalar_lea.vmem %s395_s18, 256  ;;  %p281_p5 = scmp.lt.s32.totalorder %s395_s18, %s395_s18 }
 0x185   :  { %p277_p4 = scmp.ne.s32.totalorder %s395_s18, %s276_s13  ;;  %p282_p6 = scmp.lt.s32.totalorder %s276_s13, %s276_s13 }
 0x187   :  { %p283_p7 = por %p282_p6, %p281_p5 }
 0x189   :  { %p284_p8 = pnand %p283_p7, %p277_p4 }
 0x18b   :  { %287 = shalt.err (!%p284_p8)
}
 0x18c   :  { %s288_s15 = scalar_lea.hbm %s457_s4, 256 }
 0x18d   :  { %p289_p9 = scmp.ne.s32.totalorder %s457_s4, %s288_s15  ;;  %p292_p10 = scmp.lt.u32.totalorder %s288_s15, %s457_s4 }
 0x18f   :  { %p294_p11 = pnand %p292_p10, %p289_p9 }
 0x191   :  { %297 = shalt.err (!%p294_p11)
}
 0x192   :  { %153 = dma.vmem_to_hbm [thread:$0]  %s395_s18, 256, %s457_s4, [#allocation9], %s307_s25, %s307_s25, %s308_s26  }
 0x193   :  { %302 = dma.done.wait [#allocation4], 256  }
 0x194   :  { %303 = vsyncadd [#allocation4], 4294967040 }
 0x195   :  { %304 = dma.done.wait [#allocation9], 512  }
 0x196   :  { %305 = vsyncadd [#allocation9], 4294966784 }
 0x197   :  { %163 = vsyncpa [#allocation3], 1 }
 0x198   :  { %164 = vsyncpa [#allocation6], 1 }
 0x199   :  { %165 = vsyncpa [#allocation4], 1 }
 0x19a   :  { %166 = vsyncpa [#allocation9], 1 }

</bundles_post_ra>
